<compile_context>
chip_gen: v6e
topology: v6e:2x2x1
jax: 0.10.0
libtpu: 0.0.40
codegen_flags: <defaults>
</compile_context>

<pallas_src>
import jax
import jax.numpy as jnp
from jax.experimental import pallas as pl
from jax.experimental.pallas import tpu as pltpu

INPUT_DIM = 3
HIDDEN_DIM = 128
OUTPUT_DIM = 3
SUBLANE = 8

MAX_TB = 8192            # keeps (TB,128) f32 h + activation buffers < v5e's 16 MiB scoped VMEM
MEGACORE_MIN_ROWS = 256  # below this, per-step overhead dominates; don't force a split


def _round_up(n, m):
    return ((n + m - 1) // m) * m


def _qnet_kernel(x_ref, w1_ref, b1_ref, w2_ref, b2_ref, o_ref):
    # x_ref:  (TB, 3)   f32  batch tile of inputs (lane-skinny, contiguous DMA)
    # w1_ref: (3, 128)  f32  fc1 weight, (in, out) layout, VMEM-resident
    # b1_ref: (1, 128)  f32  fc1 bias
    # w2_ref: (128, 3)  bf16 fc2 weight, (in, out) layout, VMEM-resident
    # b2_ref: (1, 3)    f32  fc2 bias
    # o_ref:  (TB, 3)   f32  batch tile of outputs
    x = x_ref[...]
    w1 = w1_ref[...]

    # fc1: contraction depth is only 3 -> 3 broadcast multiply-adds on the VPU
    # in f32 (avoids x relayout / a degenerate K=3 MXU matmul; v5e-safe).
    h = b1_ref[...]                      # (1, 128), broadcasts over batch rows
    h = h + x[:, 0:1] * w1[0:1, :]
    h = h + x[:, 1:2] * w1[1:2, :]
    h = h + x[:, 2:3] * w1[2:3, :]
    h = jnp.maximum(h, 0.0)              # ReLU, f32 on the VPU

    # fc2: bf16 operands, f32 accumulation on the MXU (single-pass MXU push);
    # bias add stays in f32. N=3 output keeps the writeback at 12 B/row.
    y = jnp.dot(h.astype(jnp.bfloat16), w2_ref[...],
                preferred_element_type=jnp.float32) + b2_ref[...]
    o_ref[...] = y.astype(o_ref.dtype)


def pack_params(w1, b1, w2, b2):
    """Pack PyTorch nn.Linear layouts into kernel layouts.

    Call ONCE per parameter update (not per forward call): these transposes /
    casts are separate XLA ops and must not sit on the per-step path.
    w1: (128, 3), b1: (128,), w2: (3, 128), b2: (3,)  (PyTorch (out, in)).
    """
    w1_t = jnp.asarray(w1, jnp.float32).T.reshape(INPUT_DIM, HIDDEN_DIM)
    b1_r = jnp.asarray(b1, jnp.float32).reshape(1, HIDDEN_DIM)
    # fc2 weight stored bf16 (MXU-native); accumulation stays f32 in-kernel.
    w2_t = jnp.asarray(w2, jnp.float32).T.reshape(HIDDEN_DIM, OUTPUT_DIM).astype(jnp.bfloat16)
    b2_r = jnp.asarray(b2, jnp.float32).reshape(1, OUTPUT_DIM)
    return w1_t, b1_r, w2_t, b2_r


def _choose_tb(batch, block_rows):
    """Pick a sublane-aligned batch tile.

    Large batches get >= 2 tiles so ("parallel",) can shard across v7x's two
    TensorCores; TB is capped so VMEM stays inside v5e's default scoped limit.
    """
    b8 = _round_up(batch, SUBLANE)
    tb = min(_round_up(block_rows, SUBLANE), b8, MAX_TB)
    if b8 >= MEGACORE_MIN_ROWS and pl.cdiv(b8, tb) < 2:
        tb = min(_round_up(pl.cdiv(b8, 2), SUBLANE), MAX_TB)
    return tb


def qnetwork_forward(x, packed_params, block_rows=2048):
    """x: (B, 3) f32. packed_params: output of pack_params(). Returns (B, 3)."""
    w1_t, b1_r, w2_t, b2_r = packed_params
    B, D = x.shape
    assert D == INPUT_DIM

    x = x.astype(jnp.float32)
    TB = _choose_tb(B, block_rows)
    grid = (pl.cdiv(B, TB),)

    # Roofline note: HBM traffic is only 24 B/row; the kernel is bound by
    # per-grid-step overhead + the fc2 MXU push, not HBM.
    flops = 2 * B * (INPUT_DIM * HIDDEN_DIM + HIDDEN_DIM * OUTPUT_DIM)
    bytes_accessed = (
        B * (INPUT_DIM + OUTPUT_DIM) * 4
        + INPUT_DIM * HIDDEN_DIM * 4 + HIDDEN_DIM * 4      # w1, b1 (f32)
        + HIDDEN_DIM * OUTPUT_DIM * 2 + OUTPUT_DIM * 4      # w2 (bf16), b2 (f32)
    )

    out = pl.pallas_call(
        _qnet_kernel,
        out_shape=jax.ShapeDtypeStruct((B, OUTPUT_DIM), jnp.float32),
        grid_spec=pltpu.PrefetchScalarGridSpec(
            num_scalar_prefetch=0,
            grid=grid,
            in_specs=[
                # Activations: tiled over batch, full (skinny) feature extent.
                # Partial last block: reads padded/garbage, writes masked.
                pl.BlockSpec((TB, INPUT_DIM), lambda i: (i, 0)),
                # Weights / biases: same block every iteration -> VMEM-resident.
                pl.BlockSpec((INPUT_DIM, HIDDEN_DIM), lambda i: (0, 0)),
                pl.BlockSpec((1, HIDDEN_DIM), lambda i: (0, 0)),
                pl.BlockSpec((HIDDEN_DIM, OUTPUT_DIM), lambda i: (0, 0)),
                pl.BlockSpec((1, OUTPUT_DIM), lambda i: (0, 0)),
            ],
            out_specs=pl.BlockSpec((TB, OUTPUT_DIM), lambda i: (i, 0)),
        ),
        compiler_params=pltpu.CompilerParams(
            # Batch tiles are independent -> megacore-shardable on v7x.
            dimension_semantics=("parallel",),
        ),
        cost_estimate=pl.CostEstimate(
            flops=flops, transcendentals=0, bytes_accessed=bytes_accessed
        ),
    )(x, w1_t, b1_r, w2_t, b2_r)

    return out


def init_params(key):
    """Deterministic init mimicking nn.Linear's uniform(-1/sqrt(fan_in), ...)."""
    k1, k2, k3, k4 = jax.random.split(key, 4)
    bound1 = 1.0 / jnp.sqrt(INPUT_DIM)
    bound2 = 1.0 / jnp.sqrt(HIDDEN_DIM)
    w1 = jax.random.uniform(k1, (HIDDEN_DIM, INPUT_DIM), jnp.float32, -bound1, bound1)
    b1 = jax.random.uniform(k2, (HIDDEN_DIM,), jnp.float32, -bound1, bound1)
    w2 = jax.random.uniform(k3, (OUTPUT_DIM, HIDDEN_DIM), jnp.float32, -bound2, bound2)
    b2 = jax.random.uniform(k4, (OUTPUT_DIM,), jnp.float32, -bound2, bound2)
    return w1, b1, w2, b2


if __name__ == "__main__":
    key = jax.random.PRNGKey(0)
    kx, kp = jax.random.split(key)

    w1, b1, w2, b2 = init_params(kp)
    packed = pack_params(w1, b1, w2, b2)   # packed once, outside the call path

    def reference(x):
        h = jnp.maximum(x @ w1.T + b1, 0.0)
        return h @ w2.T + b2

    # batch=40 with block_rows=16 -> 3-tile grid whose final block is partial
    # (rows 32..47 vs 40 valid rows), exercising masked last-block handling
    # without any wrapper-side pad/slice. batch=37 additionally exercises a
    # batch that is not a multiple of 8.
    ok = True
    for batch in (40, 37):
        x = jax.random.normal(kx, (batch, INPUT_DIM), jnp.float32)
        out = qnetwork_forward(x, packed, block_rows=16)
        out = jax.block_until_ready(out)
        y_ref = reference(x)
        ok &= out.shape == (batch, OUTPUT_DIM)
        # Tolerance loosened for bf16 fc2 operands (f32 accumulation).
        ok &= bool(jnp.allclose(out, y_ref, atol=5e-2, rtol=5e-2))

    assert ok
    print("KERNEL_OK")
</pallas_src>

<mosaic_0001>
module attributes {stable_mosaic.version = 11 : i64} {
  func.func @_qnet_kernel(%arg0: i32, %arg1: memref<16x3xf32, #tpu.memory_space<vmem>>, %arg2: memref<3x128xf32, #tpu.memory_space<vmem>>, %arg3: memref<1x128xf32, #tpu.memory_space<vmem>>, %arg4: memref<128x3xbf16, #tpu.memory_space<vmem>>, %arg5: memref<1x3xf32, #tpu.memory_space<vmem>>, %arg6: memref<16x3xf32, #tpu.memory_space<vmem>>) attributes {dimension_semantics = [#tpu.dimension_semantics<parallel>], iteration_bounds = array<i64: 3>, scalar_prefetch = 0 : i64, scratch_operands = 0 : i64, tpu.core_type = #tpu.core_type<tc>, window_params = [{transform_indices = @transform_0, window_bounds = array<i64: 16, 3>}, {pipeline_mode = #tpu.pipeline_mode<synchronous>, transform_indices = @transform_1, window_bounds = array<i64: 3, 128>}, {pipeline_mode = #tpu.pipeline_mode<synchronous>, transform_indices = @transform_2, window_bounds = array<i64: 1, 128>}, {pipeline_mode = #tpu.pipeline_mode<synchronous>, transform_indices = @transform_3, window_bounds = array<i64: 128, 3>}, {pipeline_mode = #tpu.pipeline_mode<synchronous>, transform_indices = @transform_4, window_bounds = array<i64: 1, 3>}, {transform_indices = @transform_5, window_bounds = array<i64: 16, 3>}]} {
    %c0 = arith.constant 0 : index
    %c0_0 = arith.constant 0 : index
    %0 = vector.load %arg1[%c0, %c0_0] : memref<16x3xf32, #tpu.memory_space<vmem>>, vector<16x3xf32>
    %c0_1 = arith.constant 0 : index
    %c0_2 = arith.constant 0 : index
    %1 = vector.load %arg2[%c0_1, %c0_2] : memref<3x128xf32, #tpu.memory_space<vmem>>, vector<3x128xf32>
    %c0_3 = arith.constant 0 : index
    %c0_4 = arith.constant 0 : index
    %2 = vector.load %arg3[%c0_3, %c0_4] : memref<1x128xf32, #tpu.memory_space<vmem>>, vector<1x128xf32>
    %3 = vector.extract_strided_slice %0 {offsets = [0, 0], sizes = [16, 1], strides = [1, 1]} : vector<16x3xf32> to vector<16x1xf32>
    %4 = vector.extract_strided_slice %1 {offsets = [0, 0], sizes = [1, 128], strides = [1, 1]} : vector<3x128xf32> to vector<1x128xf32>
    %5 = vector.broadcast %3 : vector<16x1xf32> to vector<16x128xf32>
    %6 = vector.broadcast %4 : vector<1x128xf32> to vector<16x128xf32>
    %7 = arith.mulf %5, %6 : vector<16x128xf32>
    %8 = vector.broadcast %2 : vector<1x128xf32> to vector<16x128xf32>
    %9 = arith.addf %8, %7 : vector<16x128xf32>
    %10 = vector.extract_strided_slice %0 {offsets = [0, 1], sizes = [16, 1], strides = [1, 1]} : vector<16x3xf32> to vector<16x1xf32>
    %11 = vector.extract_strided_slice %1 {offsets = [1, 0], sizes = [1, 128], strides = [1, 1]} : vector<3x128xf32> to vector<1x128xf32>
    %12 = vector.broadcast %10 : vector<16x1xf32> to vector<16x128xf32>
    %13 = vector.broadcast %11 : vector<1x128xf32> to vector<16x128xf32>
    %14 = arith.mulf %12, %13 : vector<16x128xf32>
    %15 = arith.addf %9, %14 : vector<16x128xf32>
    %16 = vector.extract_strided_slice %0 {offsets = [0, 2], sizes = [16, 1], strides = [1, 1]} : vector<16x3xf32> to vector<16x1xf32>
    %17 = vector.extract_strided_slice %1 {offsets = [2, 0], sizes = [1, 128], strides = [1, 1]} : vector<3x128xf32> to vector<1x128xf32>
    %18 = vector.broadcast %16 : vector<16x1xf32> to vector<16x128xf32>
    %19 = vector.broadcast %17 : vector<1x128xf32> to vector<16x128xf32>
    %20 = arith.mulf %18, %19 : vector<16x128xf32>
    %21 = arith.addf %15, %20 : vector<16x128xf32>
    %cst = arith.constant 0.000000e+00 : f32
    %22 = vector.broadcast %cst : f32 to vector<16x128xf32>
    %23 = arith.maximumf %21, %22 : vector<16x128xf32>
    %24 = arith.truncf %23 : vector<16x128xf32> to vector<16x128xbf16>
    %c0_5 = arith.constant 0 : index
    %c0_6 = arith.constant 0 : index
    %25 = vector.load %arg4[%c0_5, %c0_6] : memref<128x3xbf16, #tpu.memory_space<vmem>>, vector<128x3xbf16>
    %cst_7 = arith.constant dense<0.000000e+00> : vector<16x3xf32>
    %26 = tpu.matmul %24, %25, %cst_7 {dimension_numbers = #tpu.dot_dimension_numbers<[1], [0], [0], [1], [0, 0, 1, 1], [], []>} : vector<16x128xbf16>, vector<128x3xbf16>, vector<16x3xf32> -> vector<16x3xf32>
    %c0_8 = arith.constant 0 : index
    %c0_9 = arith.constant 0 : index
    %27 = vector.load %arg5[%c0_8, %c0_9] : memref<1x3xf32, #tpu.memory_space<vmem>>, vector<1x3xf32>
    %28 = vector.broadcast %27 : vector<1x3xf32> to vector<16x3xf32>
    %29 = arith.addf %26, %28 : vector<16x3xf32>
    %c0_10 = arith.constant 0 : index
    %c0_11 = arith.constant 0 : index
    %30 = vector.load %arg6[%c0_10, %c0_11] : memref<16x3xf32, #tpu.memory_space<vmem>>, vector<16x3xf32>
    tpu.vector_store %arg6[%c0_10, %c0_11], %29 {strides = array<i32>} : memref<16x3xf32, #tpu.memory_space<vmem>>, vector<16x3xf32>,
    return
  }
  func.func @transform_0(%arg0: i32) -> (i32, i32) {
    %c0_i32 = arith.constant 0 : i32
    %c0_i32_0 = arith.constant 0 : i32
    return %arg0, %c0_i32 : i32, i32
  }
  func.func @transform_1(%arg0: i32) -> (i32, i32) {
    %c0_i32 = arith.constant 0 : i32
    %c0_i32_0 = arith.constant 0 : i32
    %c0_i32_1 = arith.constant 0 : i32
    return %c0_i32, %c0_i32_0 : i32, i32
  }
  func.func @transform_2(%arg0: i32) -> (i32, i32) {
    %c0_i32 = arith.constant 0 : i32
    %c0_i32_0 = arith.constant 0 : i32
    %c0_i32_1 = arith.constant 0 : i32
    return %c0_i32, %c0_i32_0 : i32, i32
  }
  func.func @transform_3(%arg0: i32) -> (i32, i32) {
    %c0_i32 = arith.constant 0 : i32
    %c0_i32_0 = arith.constant 0 : i32
    %c0_i32_1 = arith.constant 0 : i32
    return %c0_i32, %c0_i32_0 : i32, i32
  }
  func.func @transform_4(%arg0: i32) -> (i32, i32) {
    %c0_i32 = arith.constant 0 : i32
    %c0_i32_0 = arith.constant 0 : i32
    %c0_i32_1 = arith.constant 0 : i32
    return %c0_i32, %c0_i32_0 : i32, i32
  }
  func.func @transform_5(%arg0: i32) -> (i32, i32) {
    %c0_i32 = arith.constant 0 : i32
    %c0_i32_0 = arith.constant 0 : i32
    return %arg0, %c0_i32 : i32, i32
  }
}

</mosaic_0001>

<bundles_post_ra>
// kernel: tpu_custom_call.1
= control target key start
LH: loop header
LB: loop body
LE: loop exit
PB: predicated region body
PF: predicated region fallthrough
CT: control target
= control target key end

     0   :  { %s939_s18 = smov 0   ;;  %s941_s19 = smov 0   ;;  %s1055_s0 = inlined_call_operand.vmem [shape: f32[40,3], index: 0, kind: input, shape index: {}]   ;;  %s1056_s1 = inlined_call_operand.vmem [shape: f32[3,128], index: 1, kind: input, shape index: {}]   ;;  %s1057_s2 = inlined_call_operand.vmem [shape: f32[1,128], index: 2, kind: input, shape index: {}]   ;;  %s1058_s3 = inlined_call_operand.vmem [shape: bf16[128,3], index: 3, kind: input, shape index: {}]   ;;  %s1059_s4 = inlined_call_operand.vmem [shape: f32[1,3], index: 4, kind: input, shape index: {}]   ;;  %s1060_s5 = inlined_call_operand.vmem [shape: f32[40,3], index: 5, kind: output, shape index: {}]  }
   0x1   :  { %s943_s20 = smov 0  }
   0x2 LB: > { %s952_s21 = sadd.s32 4294967295, %s870_s20   ;;  %s954_s22 = sadd.s32 1, %s870_s20   ;;  %s870_s20 = sphi %s943_s20, %s1064_s20   ;;  %s866_s19 = sphi %s941_s19, %s1063_s19   ;;  %s862_s18 = sphi %s939_s18, %s1062_s18  }
   0x3   : > { %s129_s23 = ssub.s32 %s870_s20, %s954_s22  ;;  %s132_s24 = sadd.s32 1, %s866_s19 }
   0x4   : > { %p130_p0 = scmp.eq.s32.totalorder %s129_s23, 0  ;;  %p142_p1 = scmp.ne.s32.totalorder %s866_s19, %s862_s18 }
   0x5   : > { %p143_p2 = scmp.eq.s32.totalorder %s952_s21, 2  ;;  %p648_p3 = scmp.ge.s32.totalorder %s870_s20, 1 }
   0x6   : > { %s962_s25 = scalar_select %p130_p0, %s866_s19, %s132_s24  }
   0x7   : > { %p964_p4 = por %p143_p2, %p142_p1  ;;  %p196_p5 = scmp.lt.s32.totalorder %s870_s20, 4 }
   0x9   : > { %p197_p6 = pnand %p648_p3, %p196_p5 }
   0xa   : > { %s969_s27 = sshll.u32 (!%p197_p6), %s952_s21, 1  ;;  %s224_s10 = sand.u32 (!%p197_p6), 1, %s862_s18  }
   0xb   : > { %200 = sbr.rel (%p197_p6) target bundleno = 401 (0x191), region = 40  ;;  %p232_p7 = scmp.lt.s32.totalorder (!%p197_p6), %s969_s27, 4 }
  0x10   : > { %v808_v0 = vld [vmem:[%s1058_s3 + $0x38] sm:$0xff]   ;;  %v904_v1 = vmov 1   ;;  %v905_v2 = vmov 0   ;;  %v906_v3 = vmov 0.0   ;;  %s233_s30 = scalar_select %p232_p7, %s969_s27, 4  ;;  %v809_v4 = vld [vmem:[%s1058_s3 + $0x30] sm:$0xff]   ;;  %v261_v14 = vlaneseq }
  0x11   : > { %805 = vset.pattern.permute.xlu1 %v904_v1  ;;  %804 = vset.pattern.permute.xlu0 %v905_v2  ;;  %v810_v6 = vld [vmem:[%s1058_s3 + $0x28] sm:$0xff]   ;;  %v811_v8 = vld [vmem:[%s1058_s3 + $0x20] sm:$0xff]   ;;  %v812_v9 = vld [vmem:[%s1058_s3 + $0x18] sm:$0xff]   ;;  %v907_v10 = vmov 2   ;;  %vm908_vm0 = vmmov 0   ;;  %vm422_vm1 = vcmask 23552  }
  0x12   : > { %691 = vmatprep.subr.bf16.mxu0 %v906_v3  ;;  %s651_s8 = sshll.u32 %s233_s30, 3  ;;  %707 = vmatprep.mubr.msk.bf16.mxu0 %vm908_vm0, %v906_v3  ;;  %v813_v11 = vld [vmem:[%s1058_s3 + $0x10] sm:$0xff]   ;;  %v814_v12 = vld [vmem:[%s1058_s3 + $0x8] sm:$0xff]   ;;  %v815_v13 = vld [vmem:[%s1058_s3] sm:$0xff]   ;;  %v262_v15 = vshrl.u32 %v261_v14, 7  ;;  %s433_s18 = ssub.s32 (%p964_p4), 5, %s969_s27 }
  0x13   : > { %692 = vmatpush3.bf16.msra.mxu0 %v808_v0  ;;  %s235_s11 = scalar_lea.vmem %s1055_s0, %s651_s8  ;;  %v249_v17 = vld [vmem:[%s1056_s1] sm:$0x7]  ;;  %s679_s15 = sshll.u32 (%p964_p4), %s952_s21, 4 }
  0x14   : > { %693 = vmatprep.subr.bf16.mxu0 %v906_v3  ;;  %v247_v5 = vld [vmem:[%s235_s11] sm:$0xff]  ;;  %v248_v7 = vld [vmem:[%s235_s11 + $0x8] sm:$0xff]  ;;  %v263_v16 = vsub.s32 0, %v262_v15  ;;  %v285_v19 = vsub.s32 1, %v262_v15  ;;  %v301_v23 = vsub.s32 2, %v262_v15  ;;  %s649_s11 = sshll.u32 %s224_s10, 4  ;;  %s1021_s20 = scalar_lea.vmem (%p964_p4), %s1060_s5, %s679_s15  }
  0x15   : > { %276 = vperm.xlu1 %805, %v247_v5   ;;  %253 = vperm.xlu0 %804, %v247_v5   ;;  %v652_v24 = vld [vmem:[%s1057_s2] ss:$0 sm:$0xff]  ;;  %s1010_s14 = scalar_lea.vmem [#allocation2], %s649_s11   ;;  %p434_p8 = scmp.lt.s32.totalorder (%p964_p4), %s433_s18, 2 }
  0x16   : > { %v264_v18 = vrot.slane %v249_v17, %v263_v16  ;;  %v286_v25 = vrot.slane %v249_v17, %v285_v19  ;;  %v302_v30 = vrot.slane %v249_v17, %v301_v23  ;;  %v653_v45 = vld [vmem:[%s1059_s4] ss:$0 sm:$0xff] }
  0x17   : > { %694 = vmatpush3.bf16.msra.mxu0 %v809_v4 }
  0x18   : > { %695 = vmatprep.subr.bf16.mxu0 %v906_v3 }
  0x19   : > { %280 = vperm.xlu1 %805, %v248_v7   ;;  %258 = vperm.xlu0 %804, %v248_v7  }
  0x1b   : > { %696 = vmatpush3.bf16.msra.mxu0 %v810_v6 }
  0x1c   : > { %697 = vmatprep.subr.bf16.mxu0 %v906_v3 }
  0x1d   : > { %807 = vset.pattern.permute.xlu1 %v907_v10  ;;  %806 = vset.pattern.permute.xlu0 %v907_v10 }
  0x1e   : > { %296 = vperm.xlu1 %807, %v248_v7   ;;  %292 = vperm.xlu0 %806, %v247_v5  }
  0x1f   : > { %698 = vmatpush3.bf16.msra.mxu0 %v811_v8 }
  0x20   : > { %699 = vmatprep.subr.bf16.mxu0 %v906_v3 }
  0x23   : > { %700 = vmatpush3.bf16.msra.mxu0 %v812_v9 }
  0x24   : > { %701 = vmatprep.subr.bf16.mxu0 %v906_v3 }
  0x27   : > { %702 = vmatpush3.bf16.msra.mxu0 %v813_v11 }
  0x28   : > { %703 = vmatprep.subr.bf16.mxu0 %v906_v3 }
  0x2b   : > { %704 = vmatpush3.bf16.msra.mxu0 %v814_v12 }
  0x2c   : > { %705 = vmatprep.subr.bf16.mxu0 %v906_v3 }
  0x2f   : > { %706 = vmatpush3.bf16.msra.mxu0 %v815_v13 }
  0x90   : > { %v277_v20 = vpop.permute.xlu1 %276  ;;  %v254_v21 = vpop.permute.xlu0 %253 }
  0x91   : > { %v265_v22 = vmul.f32 %v264_v18, %v254_v21  ;;  %v287_v33 = vmul.f32 %v286_v25, %v277_v20 }
  0x93   : > { %v273_v29 = vadd.f32 %v652_v24, %v265_v22 }
  0x94   : > { %v281_v26 = vpop.permute.xlu1 %280  ;;  %v259_v27 = vpop.permute.xlu0 %258 }
  0x95   : > { %v266_v28 = vmul.f32 %v264_v18, %v259_v27  ;;  %v288_v31 = vmul.f32 %v286_v25, %v281_v26  ;;  %v289_v38 = vadd.f32 %v287_v33, %v273_v29 }
  0x97   : > { %v274_v32 = vadd.f32 %v652_v24, %v266_v28 }
  0x99   : > { %v297_v34 = vpop.permute.xlu1 %296  ;;  %v290_v35 = vadd.f32 %v288_v31, %v274_v32  ;;  %v293_v36 = vpop.permute.xlu0 %292 }
  0x9a   : > { %v304_v37 = vmul.f32 %v302_v30, %v297_v34  ;;  %v303_v39 = vmul.f32 %v302_v30, %v293_v36 }
  0x9c   : > { %v306_v40 = vadd.f32 %v304_v37, %v290_v35  ;;  %v305_v41 = vadd.f32 %v303_v39, %v289_v38 }
  0x9e   : > { %v308_v42 = vmax.f32 %v306_v40, 0.0  ;;  %v307_v43 = vmax.f32 %v305_v41, 0.0 }
  0xa0   : > { %v309_v44 = vpack.c.bf16 %v308_v42, %v307_v43 }
  0xa2   : > { %708 = vmatmul.mubr.bf16.vlgmr.msra.gmra.mxu0 %v309_v44 }
 0x162   : > { %v415_v46 = vpop.f32.mrf.mxu0 }
 0x163   : > { %v416_v47 = vadd.f32 %v653_v45, %v415_v46 }
 0x164   : > { %v709_v48 = vpop.f32.mrf.mxu0 }
 0x165   : > { %423 = vst.msk [vmem:[%s1010_s14] sm:$0xff] %vm422_vm1, %v416_v47  ;;  %431 = sbr.rel (!%p964_p4) target bundleno = 401 (0x191), region = 44 }
 0x166   : > { %v418_v49 = vpop.f32.mrf.mxu0 }
 0x167   : > { %v419_v50 = vadd.f32 %v653_v45, %v418_v49 }
 0x168   : > { %v710_v51 = vpop.f32.mrf.mxu0 }
 0x169   : > { %424 = vst.msk [vmem:[%s1010_s14 + $0x8] sm:$0xff] %vm422_vm1, %v419_v50 }
 0x16a   : > { %s1066_s18 = smov (!%p434_p8, %s433_s18), 2 }
 0x16b   : > { %s664_s23 = sshll.u32 %s1066_s18, 7 }
 0x16c   : > { %p667_p9 = scmp.eq.s32.totalorder %s664_s23, 0 }
 0x16d   : > { %s1027_s24 = sshrl.u32 (!%p667_p9), %s1066_s18, 1 }
 0x16e   : > { %442 = sbr.rel (%p667_p9) target bundleno = 401 (0x191), region = 48  ;;  %p668_p10 = scmp.le.s32.totalorder (!%p667_p9), %s1027_s24, 0 }
 0x173   : > { %601 = sbr.rel (%p668_p10) target bundleno = 384 (0x180), region = 124  ;;  %s872_s21 = smov (!%p668_p10), %s1021_s20  }
 0x174   : > { %s876_s26 = smov (!%p668_p10), %s1010_s14   ;;  %s880_s27 = smov (!%p668_p10), 0  }
 0x175   : > { %s884_s28 = smov (!%p668_p10), 0  }
 0x178 LB: >> { %v507_v52 = vld [vmem:[%s878_s26] sm:$0xff]  ;;  %v509_v53 = vld [vmem:[%s878_s26 + $0x8] sm:$0xff]  ;;  %s511_s29 = sadd.s32 1, %s882_s27  ;;  %s501_s28 = sadd.s32 1, %s886_s28   ;;  %s886_s28 = sphi %s884_s28, %s501_s28   ;;  %s882_s27 = sphi %s880_s27, %s881_s27   ;;  %s878_s26 = sphi %s876_s26, %s516_s26   ;;  %s874_s21 = sphi %s872_s21, %s517_s21  }
 0x179   : >> { %508 = vst [vmem:[%s874_s21] sm:$0xff] %v507_v52  ;;  %510 = vst [vmem:[%s874_s21 + $0x8] sm:$0xff] %v509_v53  ;;  %p512_p11 = scmp.ge.s32.totalorder %s511_s29, %s1027_s24  ;;  %p500_p12 = scmp.ge.s32.totalorder %s501_s28, %s1027_s24 }
 0x17b   : >> { %s1068_s29 = smov (%p512_p11, %s511_s29), 0  ;;  %503 = sbr.rel (!%p500_p12) target bundleno = 376 (0x178), region = 130 }
 0x17c   : >> { %s669_s30 = sshll.u32 %s1068_s29, 4  ;;  %s881_s27 = smov %s1068_s29  }
 0x17d   : >> { %s516_s26 = scalar_lea.vmem %s1010_s14, %s669_s30 [#allocation2]   ;;  %s517_s21 = scalar_lea.vmem %s1021_s20, %s669_s30  }
 0x180 PF: > { %s1037_s6 = sand.u32 1, %s1066_s18   ;;  %s680_s7 = sshll.u32 %s1027_s24, 4 }
 0x181   : > { %s522_s8 = scalar_lea.vmem %s1010_s14, %s680_s7 [#allocation2]   ;;  %s524_s9 = scalar_lea.vmem %s1021_s20, %s680_s7  }
 0x182   : > { %p674_p13 = scmp.le.s32.totalorder %s1037_s6, 0 }
 0x183   : > { %s888_s10 = smov (!%p674_p13), %s524_s9   ;;  %s892_s11 = smov (!%p674_p13), %s522_s8  }
 0x184   : > { %615 = sbr.rel (%p674_p13) target bundleno = 401 (0x191), region = 135  ;;  %s896_s12 = smov (!%p674_p13), 0  }
 0x185   : > { %s900_s13 = smov (!%p674_p13), 0  }
 0x189 LB: >> { %v534_v54 = vld [vmem:[%s894_s11] sm:$0xff]  ;;  %s536_s18 = sadd.s32 1, %s898_s12  ;;  %s528_s13 = sadd.s32 1, %s902_s13   ;;  %s902_s13 = sphi %s900_s13, %s528_s13   ;;  %s898_s12 = sphi %s896_s12, %s897_s12   ;;  %s894_s11 = sphi %s892_s11, %s541_s11   ;;  %s890_s10 = sphi %s888_s10, %s542_s10  }
 0x18a   : >> { %535 = vst [vmem:[%s890_s10] sm:$0xff] %v534_v54  ;;  %p537_p0 = scmp.ge.s32.totalorder %s536_s18, %s1037_s6  ;;  %p527_p1 = scmp.ge.s32.totalorder %s528_s13, %s1037_s6 }
 0x18c   : >> { %s1070_s18 = smov (%p537_p0, %s536_s18), 0  ;;  %530 = sbr.rel (!%p527_p1) target bundleno = 393 (0x189), region = 141 }
 0x18d   : >> { %s675_s14 = sshll.u32 %s1070_s18, 3  ;;  %s897_s12 = smov %s1070_s18  }
 0x18e   : >> { %s541_s11 = scalar_lea.vmem %s522_s8, %s675_s14 [#allocation2]   ;;  %s542_s10 = scalar_lea.vmem %s524_s9, %s675_s14  }
 0x191 PF: > { %p12_p2 = scmp.ge.s32.totalorder %s954_s22, 5   ;;  %s1062_s18 = smov %s866_s19 }
 0x192   : > { %s1063_s19 = smov %s962_s25  ;;  %s1064_s20 = smov %s954_s22 }
 0x193   :  { %14 = sbr.rel (!%p12_p2) target bundleno = 2 (0x2), region = 152 }

</bundles_post_ra>
